<compile_context>
chip_gen: v7x
topology: tpu7x:2x2x1
jax: 0.10.0
libtpu: 0.0.40
codegen_flags: <defaults>
</compile_context>

<pallas_src>
import functools
import math

import jax
import jax.numpy as jnp
from jax import lax
from jax.experimental import pallas as pl
from jax.experimental.pallas import tpu as pltpu

NUM_CLASSES = 6      # synthetic class count (reference uses 21 for VOC)
PRIOR_DIM = 4        # priors per spatial location for every head
BATCH = 2

VGG_CFG = [4, 4, 'M', 8, 8, 'M', 16, 16, 16, 'C', 32, 32, 32, 'M', 32, 32, 32]


# ----------------------------------------------------------------------------
# small helpers
# ----------------------------------------------------------------------------
def _round_up(v, m):
    return ((v + m - 1) // m) * m


def _choose_tm(m, cap=1024):
    """Row-tile size: multiple of 8, <= cap, and >=2 grid steps when possible (v7x 2 TCs)."""
    mr = _round_up(m, 8)
    tm = min(mr, cap)
    if tm == mr and mr > 8:          # would be a single grid step -> split in two
        tm = _round_up((mr + 1) // 2, 8)
    return tm


# ----------------------------------------------------------------------------
# Pallas kernels
# ----------------------------------------------------------------------------
def _matmul_bias_kernel(x_ref, w_ref, b_ref, o_ref, *, relu):
    acc = jnp.dot(x_ref[...], w_ref[...], preferred_element_type=jnp.float32)
    acc = acc + b_ref[...]
    if relu:
        acc = jnp.maximum(acc, 0.0)
    o_ref[...] = acc


def matmul_bias(x, w, b, relu=False):
    """(M,K) @ (K,N) + b with optional fused ReLU.  bf16 MXU inputs, f32 accumulation."""
    M, K = x.shape
    N = w.shape[1]
    TM = _choose_tm(M)
    Mp = _round_up(M, TM)
    xp = x if Mp == M else jnp.pad(x, ((0, Mp - M), (0, 0)))
    xb = xp.astype(jnp.bfloat16)
    wb = w.astype(jnp.bfloat16)
    bm = b.reshape(1, N).astype(jnp.float32)
    # VMEM budget: double-buffered bf16 input block + resident bf16 weights + f32 output.
    need = 2 * TM * K * 2 + 2 * K * N * 2 + 2 * TM * N * 4 + N * 4 + (1 << 20)
    vlim = int(min(max(4 * need, 16 * 2**20), 32 * 2**20))
    out = pl.pallas_call(
        functools.partial(_matmul_bias_kernel, relu=relu),
        out_shape=jax.ShapeDtypeStruct((Mp, N), jnp.float32),
        grid=(Mp // TM,),
        in_specs=[
            pl.BlockSpec((TM, K), lambda i: (i, 0)),
            pl.BlockSpec((K, N), lambda i: (0, 0)),
            pl.BlockSpec((1, N), lambda i: (0, 0)),
        ],
        out_specs=pl.BlockSpec((TM, N), lambda i: (i, 0)),
        compiler_params=pltpu.CompilerParams(
            dimension_semantics=("parallel",), vmem_limit_bytes=vlim),
    )(xb, wb, bm)
    return out[:M] if Mp != M else out


def _l2norm_kernel(x_ref, w_ref, o_ref):
    x = x_ref[...]
    nrm = jnp.sqrt(jnp.sum(x * x, axis=-1, keepdims=True)) + 1e-10
    o_ref[...] = x * pl.reciprocal(nrm, approx=True) * w_ref[...]


def l2norm_nhwc(x, weight):
    """SSD L2Norm on NHWC activations (no layout transposes), row-tiled."""
    N, H, W, C = x.shape
    M = N * H * W
    xm = x.reshape(M, C).astype(jnp.float32)
    TM = _choose_tm(M, cap=512)
    Mp = _round_up(M, TM)
    xp = xm if Mp == M else jnp.pad(xm, ((0, Mp - M), (0, 0)))
    out = pl.pallas_call(
        _l2norm_kernel,
        out_shape=jax.ShapeDtypeStruct((Mp, C), jnp.float32),
        grid=(Mp // TM,),
        in_specs=[pl.BlockSpec((TM, C), lambda i: (i, 0)),
                  pl.BlockSpec((1, C), lambda i: (0, 0))],
        out_specs=pl.BlockSpec((TM, C), lambda i: (i, 0)),
        compiler_params=pltpu.CompilerParams(dimension_semantics=("parallel",)),
    )(xp, weight.reshape(1, C).astype(jnp.float32))
    out = out[:M] if Mp != M else out
    return out.reshape(N, H, W, C)


def _relation_kernel(cls_ref, src_ref, r_ref, w_ref, b_ref, o_ref):
    """Fused get_enhanced_source + rel linear + concat for ONE batch element.

    softmax(cls_pred) -> argmax over (prior, class) -> %num_classes -> local graph
    (via one-hot matmuls against cls_r_prob, gather-free) -> G @ S -> @ rel_W + b
    -> concat([S, rel_feat]).
    """
    x = cls_ref[0]                        # (L, P, NC) f32
    L, P, NC = x.shape
    s = src_ref[0]                        # (L, C)
    C = s.shape[1]
    R = r_ref[...]                        # (NC, NC)

    # per-prior softmax over classes
    m = jnp.max(x, axis=-1, keepdims=True)
    e = jnp.exp(x - m)
    p = e / jnp.sum(e, axis=-1, keepdims=True)          # (L, P, NC)

    # argmax over the flattened (prior, class) axis, then % NC  (first-occurrence ties)
    flat_idx = (lax.broadcasted_iota(jnp.int32, (L, P, NC), 1) * NC
                + lax.broadcasted_iota(jnp.int32, (L, P, NC), 2))
    pmax = jnp.max(jnp.max(p, axis=2, keepdims=True), axis=1, keepdims=True)
    cand = jnp.where(p >= pmax, flat_idx, jnp.int32(P * NC))
    idx = jnp.min(jnp.min(cand, axis=2), axis=1, keepdims=True)    # (L, 1)
    cls_idx = idx % NC                                              # (L, 1) int32

    oh = (cls_idx == lax.broadcasted_iota(jnp.int32, (L, NC), 1)).astype(jnp.float32)
    dmask = (cls_idx != 0).astype(jnp.float32)                      # (L, 1)

    if L == 1:
        # degenerate 1-node graph: only the diagonal survives
        fused = dmask * s                                           # (1, C)
    else:
        tmp = jnp.dot(oh, R, preferred_element_type=jnp.float32)    # tmp[i,d] = R[ci, d]
        pair = lax.dot_general(tmp, oh, (((1,), (1,)), ((), ())),
                               preferred_element_type=jnp.float32)  # R[ci, cj]
        pairT = lax.dot_general(oh, tmp, (((1,), (1,)), ((), ())),
                                preferred_element_type=jnp.float32)  # R[cj, ci]
        ri = lax.broadcasted_iota(jnp.int32, (L, L), 0)
        cj = lax.broadcasted_iota(jnp.int32, (L, L), 1)
        lower = (cj < ri).astype(jnp.float32)
        upper = (cj > ri).astype(jnp.float32)
        g = pair * lower + pairT * upper + jnp.where(ri == cj, dmask, 0.0)
        fused = jnp.dot(g, s, preferred_element_type=jnp.float32)   # (L, C)

    rel_feat = jnp.dot(fused, w_ref[...],
                       preferred_element_type=jnp.float32) + b_ref[...]   # (L, Cr)
    o_ref[0, :, 0:C] = s
    o_ref[0, :, C:] = rel_feat


def relation_reasoning(cls4, src, cls_r_prob, rel_w, rel_b):
    """(N,L,P,NC) conf preds + (N,L,C) source -> (N,L,C+Cr) [source | rel(G @ source)]."""
    N, L, P, NC = cls4.shape
    C = src.shape[2]
    Cr = rel_w.shape[1]
    return pl.pallas_call(
        _relation_kernel,
        out_shape=jax.ShapeDtypeStruct((N, L, C + Cr), jnp.float32),
        grid=(N,),
        in_specs=[pl.BlockSpec((1, L, P, NC), lambda n: (n, 0, 0, 0)),
                  pl.BlockSpec((1, L, C), lambda n: (n, 0, 0)),
                  pl.BlockSpec((NC, NC), lambda n: (0, 0)),
                  pl.BlockSpec((C, Cr), lambda n: (0, 0)),
                  pl.BlockSpec((1, Cr), lambda n: (0, 0))],
        out_specs=pl.BlockSpec((1, L, C + Cr), lambda n: (n, 0, 0)),
        compiler_params=pltpu.CompilerParams(dimension_semantics=("parallel",)),
    )(cls4.astype(jnp.float32), src.astype(jnp.float32),
      cls_r_prob.astype(jnp.float32), rel_w.astype(jnp.float32),
      rel_b.reshape(1, Cr).astype(jnp.float32))


# ----------------------------------------------------------------------------
# Layer wrappers (NHWC; im2col/reshapes are plain-JAX glue; matmuls are Pallas)
# ----------------------------------------------------------------------------
def conv2d(x, w, b, stride=1, padding=0, dilation=1, relu=False):
    """NHWC Conv2d via bf16 im2col + Pallas matmul with fused bias/ReLU."""
    # TODO(synk): im2col taps stay in plain JAX (strided (kh,kw) slices are not
    # expressible with a simple BlockSpec index_map for stride>1); they are built in
    # bf16 and channel-last so the Pallas matmul reads lane-dense tiles.
    N, H, W, C = x.shape
    O, Ci, KH, KW = w.shape
    Ho = (H + 2 * padding - dilation * (KH - 1) - 1) // stride + 1
    Wo = (W + 2 * padding - dilation * (KW - 1) - 1) // stride + 1
    xb = x.astype(jnp.bfloat16)
    if KH == 1 and KW == 1 and padding == 0 and stride == 1:
        patches = xb.reshape(N * H * W, C)
    else:
        xp = jnp.pad(xb, ((0, 0), (padding, padding), (padding, padding), (0, 0)))
        taps = []
        for kh in range(KH):
            for kw in range(KW):
                hs, ws = kh * dilation, kw * dilation
                taps.append(xp[:, hs:hs + stride * (Ho - 1) + 1:stride,
                               ws:ws + stride * (Wo - 1) + 1:stride, :])
        patches = jnp.concatenate(taps, axis=-1).reshape(N * Ho * Wo, KH * KW * C)
    wm = jnp.transpose(w, (2, 3, 1, 0)).reshape(KH * KW * Ci, O)
    out = matmul_bias(patches, wm, b, relu=relu)        # (N*Ho*Wo, O)
    return out.reshape(N, Ho, Wo, O)


def head_conv(src, lconv, cconv):
    """Fused loc+conf 3x3 heads on one source: one patch read, one matmul, split after."""
    w = jnp.concatenate([lconv['w'], cconv['w']], axis=0)
    b = jnp.concatenate([lconv['b'], cconv['b']], axis=0)
    out = conv2d(src, w, b, padding=1)                  # NHWC, last dim = Ol + Oc
    Ol = lconv['w'].shape[0]
    return out[..., :Ol], out[..., Ol:]


def conv_transpose_2x2(x, w, b):
    """ConvTranspose2d(kernel=2, stride=2) on NHWC via Pallas matmul."""
    N, H, W, Ci = x.shape
    Co = w.shape[1]
    xm = x.reshape(N * H * W, Ci)
    wm = w.reshape(Ci, Co * 4)
    bm = jnp.repeat(b, 4)
    out = matmul_bias(xm, wm, bm)                       # (N*H*W, Co*4)
    out = out.reshape(N, H, W, Co, 2, 2)
    out = jnp.transpose(out, (0, 1, 4, 2, 5, 3)).reshape(N, 2 * H, 2 * W, Co)
    return out


def max_pool2d(x, k, s, p=0, ceil_mode=False):
    # maxpool is cheap glue; the conv/matmul hot path lives in Pallas.
    N, H, W, C = x.shape

    def osz(L):
        v = (L + 2 * p - k) / s
        return int(math.ceil(v) if ceil_mode else math.floor(v)) + 1

    Ho, Wo = osz(H), osz(W)
    ph_r = max((Ho - 1) * s + k - H - p, 0)
    pw_r = max((Wo - 1) * s + k - W - p, 0)
    neg = jnp.float32(-jnp.inf)
    xp = jnp.pad(x, ((0, 0), (p, max(ph_r, p)), (p, max(pw_r, p)), (0, 0)),
                 constant_values=neg)
    return lax.reduce_window(xp, neg, lax.max,
                             window_dimensions=(1, k, k, 1),
                             window_strides=(1, s, s, 1),
                             padding='VALID')


def apply_vgg_layer(layer, x):
    if layer['type'] == 'conv':
        return conv2d(x, layer['w'], layer['b'], stride=layer['s'], padding=layer['p'],
                      dilation=layer['d'], relu=layer.get('relu', False))
    return max_pool2d(x, layer['k'], layer['s'], layer['p'], layer['ceil'])


# ----------------------------------------------------------------------------
# relation_SSD forward
# ----------------------------------------------------------------------------
def relation_ssd_forward(params, x, targets):
    # TODO(synk): the reference's match()/loc_t/conf_t/region_pos_final are dead code
    # (never used by the returned values), so the prior-box matching step is omitted.
    sources, loc, conf = [], [], []

    h = jnp.transpose(x, (0, 2, 3, 1))                  # single NCHW -> NHWC transpose
    split = params['vgg_l2_split']
    for layer in params['vgg'][:split]:
        h = apply_vgg_layer(layer, h)
    sources.append(l2norm_nhwc(h, params['l2norm_weight']))
    for layer in params['vgg'][split:]:
        h = apply_vgg_layer(layer, h)
    sources.append(h)
    for k, lyr in enumerate(params['extras']):
        h = conv2d(h, lyr['w'], lyr['b'], stride=lyr['s'], padding=lyr['p'],
                   dilation=lyr['d'], relu=True)
        if k % 2 == 1:
            sources.append(h)
    sources = sources[::-1]

    x_prev = conf_pred_prev = None
    for stage, (src, lconv, cconv) in enumerate(
            zip(sources, params['loc'], params['conf'])):
        if stage in (0, 1, 3, 5):
            loc_p, conf_p = head_conv(src, lconv, cconv)
            loc.append(loc_p)
            conf.append(conf_p)
            x_prev, conf_pred_prev = src, conf_p
        else:
            rel = params['rel_transform'][stage - 1]
            Nb, Hp, Wp, Cp = x_prev.shape
            L = Hp * Wp
            cls4 = conf_pred_prev.reshape(Nb, L, PRIOR_DIM, NUM_CLASSES)
            src_flat = x_prev.reshape(Nb, L, Cp)
            # fused: softmax+argmax+graph+bmm+rel-linear+concat (one kernel, grid=batch)
            reasoned = relation_reasoning(cls4, src_flat, params['cls_r_prob'],
                                          rel['w'], rel['b'])       # (Nb, L, Cp+Cr)
            # mirrors the reference's .permute(0, 3, 2, 1) (H/W swap) in NHWC layout
            enhanced = jnp.transpose(reasoned.reshape(Nb, Hp, Wp, -1), (0, 2, 1, 3))
            bufc = params['buf_conv'][stage - 1]
            upc = params['upscaling_conv'][stage - 1]
            x_prev = (conv2d(src, bufc['w'], bufc['b'], padding=1)
                      + conv_transpose_2x2(enhanced, upc['w'], upc['b']))
            loc_p, conf_p = head_conv(x_prev, lconv, cconv)
            loc.append(loc_p)
            conf.append(conf_p)
            conf_pred_prev = conf_p

    Nb = x.shape[0]
    loc_cat = jnp.concatenate([o.reshape(Nb, -1) for o in loc], axis=1)
    conf_cat = jnp.concatenate([o.reshape(Nb, -1) for o in conf], axis=1)
    # phase == 'train' output tuple.
    # TODO(synk): Detect()/NMS ('test' phase) has no clean Pallas equivalent and is omitted.
    return (loc_cat.reshape(Nb, -1, 4),
            conf_cat.reshape(Nb, -1, NUM_CLASSES),
            params['priors'])


# ----------------------------------------------------------------------------
# Deterministic parameter construction (synthetic, scaled-down SSD)
# ----------------------------------------------------------------------------
def make_params(key):
    keys = iter(jax.random.split(key, 128))
    nk = lambda: next(keys)

    def conv_p(cin, cout, k, s=1, p=0, d=1):
        w = jax.random.normal(nk(), (cout, cin, k, k), jnp.float32) / math.sqrt(cin * k * k)
        b = jax.random.normal(nk(), (cout,), jnp.float32) * 0.01
        return {'w': w, 'b': b, 's': s, 'p': p, 'd': d}

    def lin_p(cin, cout):
        w = jax.random.normal(nk(), (cin, cout), jnp.float32) / math.sqrt(cin)
        b = jax.random.normal(nk(), (cout,), jnp.float32) * 0.01
        return {'w': w, 'b': b}

    def convT_p(cin, cout):
        w = jax.random.normal(nk(), (cin, cout, 2, 2), jnp.float32) / math.sqrt(cin * 4)
        b = jax.random.normal(nk(), (cout,), jnp.float32) * 0.01
        return {'w': w, 'b': b}

    # vgg base (channels scaled down; conv+ReLU fused into single entries)
    vgg, c = [], 3
    conv_count, l2_split = 0, None
    for v in VGG_CFG:
        if v == 'M':
            vgg.append({'type': 'pool', 'k': 2, 's': 2, 'p': 0, 'ceil': False})
        elif v == 'C':
            vgg.append({'type': 'pool', 'k': 2, 's': 2, 'p': 0, 'ceil': True})
        else:
            vgg.append({'type': 'conv', 'relu': True, **conv_p(c, v, 3, 1, 1, 1)})
            c = v
            conv_count += 1
            if conv_count == 10:            # conv4_3(+ReLU) == reference vgg[:23]
                l2_split = len(vgg)
    vgg.append({'type': 'pool', 'k': 3, 's': 1, 'p': 1, 'ceil': False})   # pool5
    vgg.append({'type': 'conv', 'relu': True, **conv_p(c, 64, 3, 1, 6, 6)})   # conv6
    vgg.append({'type': 'conv', 'relu': True, **conv_p(64, 64, 1, 1, 0, 1)})  # conv7

    extras_cfg = [(64, 16, 1, 1, 0), (16, 32, 3, 2, 1),
                  (32, 8, 1, 1, 0), (8, 16, 3, 2, 1),
                  (16, 8, 1, 1, 0), (8, 16, 3, 2, 1),
                  (16, 8, 1, 1, 0), (8, 16, 3, 1, 1)]
    extras = [conv_p(ci, co, k, s, p) for (ci, co, k, s, p) in extras_cfg]

    # per-stage (reversed-source order) head input channels
    head_in = [16, 16, 32, 32, 64, 32]
    loc_heads = [conv_p(ci, PRIOR_DIM * 4, 3, 1, 1) for ci in head_in]
    conf_heads = [conv_p(ci, PRIOR_DIM * NUM_CLASSES, 3, 1, 1) for ci in head_in]

    rel = {1: lin_p(16, 16), 3: lin_p(32, 32)}
    upscale = {1: convT_p(32, 32), 3: convT_p(64, 64)}
    buf = {1: conv_p(16, 32, 3, 1, 1), 3: conv_p(64, 64, 3, 1, 1)}

    # synthetic PriorBox output (its values only feed dead match() code)
    total_priors = sum(hw * PRIOR_DIM for hw in (1, 1, 4, 16, 64, 256))
    priors = jax.random.uniform(nk(), (total_priors, 4), jnp.float32)
    cls_r_prob = jax.random.uniform(nk(), (NUM_CLASSES, NUM_CLASSES), jnp.float32)
    l2norm_weight = jnp.full((32,), 20.0, jnp.float32)

    return {'vgg': vgg, 'vgg_l2_split': l2_split, 'extras': extras,
            'loc': loc_heads, 'conf': conf_heads,
            'rel_transform': rel, 'upscaling_conv': upscale, 'buf_conv': buf,
            'priors': priors, 'cls_r_prob': cls_r_prob,
            'l2norm_weight': l2norm_weight}


if __name__ == "__main__":
    key = jax.random.PRNGKey(0)
    pkey, xkey, tkey = jax.random.split(key, 3)
    params = make_params(pkey)

    x = jax.random.normal(xkey, (BATCH, 3, 128, 128), jnp.float32)
    tk1, tk2 = jax.random.split(tkey)
    targets = [
        jnp.concatenate([jax.random.uniform(tk1, (3, 4)),
                         jnp.array([[1.0], [2.0], [3.0]], jnp.float32)], axis=1),
        jnp.concatenate([jax.random.uniform(tk2, (3, 4)),
                         jnp.array([[4.0], [5.0], [1.0]], jnp.float32)], axis=1),
    ]

    loc_out, conf_out, priors = relation_ssd_forward(params, x, targets)
    jax.block_until_ready((loc_out, conf_out, priors))

    assert loc_out.shape == (BATCH, 1368, 4), loc_out.shape
    assert conf_out.shape == (BATCH, 1368, NUM_CLASSES), conf_out.shape
    assert priors.shape == (1368, 4), priors.shape
    print("KERNEL_OK")
</pallas_src>

<mosaic_0001>
module attributes {stable_mosaic.version = 11 : i64} {
  func.func @_matmul_bias_kernel(%arg0: i32, %arg1: memref<1024x27xbf16, #tpu.memory_space<vmem>>, %arg2: memref<27x4xbf16, #tpu.memory_space<vmem>>, %arg3: memref<1x4xf32, #tpu.memory_space<vmem>>, %arg4: memref<1024x4xf32, #tpu.memory_space<vmem>>) attributes {dimension_semantics = [#tpu.dimension_semantics<parallel>], iteration_bounds = array<i64: 32>, scalar_prefetch = 0 : i64, scratch_operands = 0 : i64, tpu.core_type = #tpu.core_type<tc>, window_params = [{transform_indices = @transform_0, window_bounds = array<i64: 1024, 27>}, {pipeline_mode = #tpu.pipeline_mode<synchronous>, transform_indices = @transform_1, window_bounds = array<i64: 27, 4>}, {pipeline_mode = #tpu.pipeline_mode<synchronous>, transform_indices = @transform_2, window_bounds = array<i64: 1, 4>}, {transform_indices = @transform_3, window_bounds = array<i64: 1024, 4>}]} {
    %c0 = arith.constant 0 : index
    %c0_0 = arith.constant 0 : index
    %0 = vector.load %arg1[%c0, %c0_0] : memref<1024x27xbf16, #tpu.memory_space<vmem>>, vector<1024x27xbf16>
    %c0_1 = arith.constant 0 : index
    %c0_2 = arith.constant 0 : index
    %1 = vector.load %arg2[%c0_1, %c0_2] : memref<27x4xbf16, #tpu.memory_space<vmem>>, vector<27x4xbf16>
    %cst = arith.constant dense<0.000000e+00> : vector<1024x4xf32>
    %2 = tpu.matmul %0, %1, %cst {dimension_numbers = #tpu.dot_dimension_numbers<[1], [0], [0], [1], [0, 0, 1, 1], [], []>} : vector<1024x27xbf16>, vector<27x4xbf16>, vector<1024x4xf32> -> vector<1024x4xf32>
    %c0_3 = arith.constant 0 : index
    %c0_4 = arith.constant 0 : index
    %3 = vector.load %arg3[%c0_3, %c0_4] : memref<1x4xf32, #tpu.memory_space<vmem>>, vector<1x4xf32>
    %4 = vector.broadcast %3 : vector<1x4xf32> to vector<1024x4xf32>
    %5 = arith.addf %2, %4 : vector<1024x4xf32>
    %cst_5 = arith.constant 0.000000e+00 : f32
    %6 = vector.broadcast %cst_5 : f32 to vector<1024x4xf32>
    %7 = arith.maximumf %5, %6 : vector<1024x4xf32>
    %c0_6 = arith.constant 0 : index
    %c0_7 = arith.constant 0 : index
    %8 = vector.load %arg4[%c0_6, %c0_7] : memref<1024x4xf32, #tpu.memory_space<vmem>>, vector<1024x4xf32>
    tpu.vector_store %arg4[%c0_6, %c0_7], %7 {strides = array<i32>} : memref<1024x4xf32, #tpu.memory_space<vmem>>, vector<1024x4xf32>,
    return
  }
  func.func @transform_0(%arg0: i32) -> (i32, i32) {
    %c0_i32 = arith.constant 0 : i32
    %c0_i32_0 = arith.constant 0 : i32
    return %arg0, %c0_i32 : i32, i32
  }
  func.func @transform_1(%arg0: i32) -> (i32, i32) {
    %c0_i32 = arith.constant 0 : i32
    %c0_i32_0 = arith.constant 0 : i32
    %c0_i32_1 = arith.constant 0 : i32
    return %c0_i32, %c0_i32_0 : i32, i32
  }
  func.func @transform_2(%arg0: i32) -> (i32, i32) {
    %c0_i32 = arith.constant 0 : i32
    %c0_i32_0 = arith.constant 0 : i32
    %c0_i32_1 = arith.constant 0 : i32
    return %c0_i32, %c0_i32_0 : i32, i32
  }
  func.func @transform_3(%arg0: i32) -> (i32, i32) {
    %c0_i32 = arith.constant 0 : i32
    %c0_i32_0 = arith.constant 0 : i32
    return %arg0, %c0_i32 : i32, i32
  }
}

</mosaic_0001>

<bundles_post_ra>
// kernel: tpu_custom_call.1
= control target key start
LH: loop header
LB: loop body
LE: loop exit
PB: predicated region body
PF: predicated region fallthrough
CT: control target
= control target key end

     0   :  { %s2151_s12 = smov 0   ;;  %s2699_s0 = inlined_call_operand.vmem [shape: bf16[32768,27], index: 0, kind: input, shape index: {}]   ;;  %s2700_s1 = inlined_call_operand.vmem [shape: bf16[27,4], index: 1, kind: input, shape index: {}]   ;;  %s2701_s2 = inlined_call_operand.vmem [shape: f32[1,4], index: 2, kind: input, shape index: {}]   ;;  %s2702_s3 = inlined_call_operand.vmem [shape: f32[32768,4], index: 3, kind: output, shape index: {}]  }
   0x1 LB: > { %s1703_s13 = sadd.s32 4294967295, %s2128_s12   ;;  %p1707_p0 = scmp.ge.s32.totalorder %s2128_s12, 1  ;;  %s2128_s12 = sphi %s2151_s12, %s13_s12  }
   0x2   : > { %p138_p1 = scmp.lt.s32.totalorder %s2128_s12, 33 }
   0x4   : > { %p139_p2 = pnand %p1707_p0, %p138_p1 }
   0x5   : > { %v2056_v0 = vld [vmem:[%s2700_s1] sm:$0xff] (!%p139_p2)   ;;  %vm838_vm0 = vcmask (!%p139_p2), 1044480   ;;  %v2057_v1 = vld [vmem:[%s2700_s1 + $0x8] sm:$0x3f] (!%p139_p2)   ;;  %vm839_vm1 = vcmask (!%p139_p2), 1045504   ;;  %s1708_s18 = sshll.u32 (!%p139_p2), %s1703_s13, 7 }
   0x6   : > { %142 = sbr.rel (%p139_p2) target bundleno = 359 (0x167), region = 32  ;;  %1911 = vmatprep.subr.bf16.mxu0 (!%p139_p2), %v2056_v0  ;;  %2043 = vmatprep.subr.bf16.mxu1 (!%p139_p2), %v2056_v0  ;;  %v2130_v2 = vmov (!%p139_p2), 65535   ;;  %p163_p3 = scmp.lt.s32.totalorder (!%p139_p2), %s1708_s18, 4095  ;;  %vm645_vm2 = vcmask (!%p139_p2), 220160   ;;  %vm1518_vm3 = vcmask (!%p139_p2), 31744  }
   0x7   : > { %1912 = vmatpush3.bf16.msra.mxu0 (!%p139_p2), %v2056_v0  ;;  %2045 = vmatpush3.bf16.msra.mxu1 (!%p139_p2), %v2056_v0  ;;  %v840_v3 = vsel (!%p139_p2), %vm838_vm0, 4294967295, %v2130_v2 }
   0x8   : > { %v841_v4 = vsel (!%p139_p2), %vm839_vm1, %v840_v3, 0 }
   0x9   : > { %v843_v5 = vand.u32 (!%p139_p2), %v2057_v1, %v841_v4 }
   0xb   : > { %1913 = vmatprep.subr.bf16.mxu0 (!%p139_p2), %v843_v5  ;;  %2044 = vmatprep.subr.bf16.mxu1 (!%p139_p2), %v843_v5 }
   0xc   : > { %1914 = vmatpush3.bf16.msra.mxu0 (!%p139_p2), %v843_v5  ;;  %2046 = vmatpush3.bf16.msra.mxu1 (!%p139_p2), %v843_v5 }
   0xd   : > { %s2704_s18 = smov (!%p163_p3, %s1708_s18), 4095 }
   0xe   : > { %s1709_s19 = sshll.u32 %s2704_s18, 2  ;;  %s1711_s25 = sshll.u32 %s2704_s18, 3 }
   0xf   : > { %s2171_s22 = scalar_lea.vmem %s2699_s0, %s1709_s19  ;;  %s2311_s28 = scalar_lea.vmem %s2702_s3, %s1711_s25 }
  0x10   : > { %v2058_v6 = vld [vmem:[%s2171_s22] sm:$0xff]   ;;  %v2060_v8 = vld [vmem:[%s2171_s22 + $0x8] sm:$0xff]   ;;  %v2062_v10 = vld [vmem:[%s2171_s22 + $0x10] sm:$0xff]  }
  0x11   : > { %v2059_v7 = vld [vmem:[%s2171_s22 + $0x100] sm:$0xff]   ;;  %1915 = vmatprep.mubr.msk.bf16.mxu0 %vm645_vm2, %v2058_v6  ;;  %v2061_v9 = vld [vmem:[%s2171_s22 + $0x108] sm:$0xff]   ;;  %v2063_v11 = vld [vmem:[%s2171_s22 + $0x110] sm:$0xff]  }
  0x12   : > { %1979 = vmatprep.mubr.msk.bf16.mxu1 %vm645_vm2, %v2059_v7  ;;  %1916 = vmatmul.mubr.msk.bf16.vlgmr.msra.gmra.mrb[0].mxu0 %vm645_vm2, %v2060_v8  ;;  %v2064_v12 = vld [vmem:[%s2171_s22 + $0x18] sm:$0xff]   ;;  %v2066_v14 = vld [vmem:[%s2171_s22 + $0x20] sm:$0xff]   ;;  %v2068_v16 = vld [vmem:[%s2171_s22 + $0x28] sm:$0xff]  }
  0x13   : > { %1980 = vmatmul.mubr.msk.bf16.vlgmr.msra.gmra.mrb[0].mxu1 %vm645_vm2, %v2061_v9  ;;  %1919 = vmatprep.mubr.msk.bf16.mxu0 %vm645_vm2, %v2062_v10  ;;  %v2065_v13 = vld [vmem:[%s2171_s22 + $0x118] sm:$0xff]   ;;  %v2067_v15 = vld [vmem:[%s2171_s22 + $0x120] sm:$0xff]   ;;  %v2069_v17 = vld [vmem:[%s2171_s22 + $0x128] sm:$0xff]  }
  0x14   : > { %1983 = vmatprep.mubr.msk.bf16.mxu1 %vm645_vm2, %v2063_v11  ;;  %v2070_v18 = vld [vmem:[%s2171_s22 + $0x30] sm:$0xff]   ;;  %v2072_v20 = vld [vmem:[%s2171_s22 + $0x38] sm:$0xff]   ;;  %v2074_v22 = vld [vmem:[%s2171_s22 + $0x40] sm:$0xff]  }
  0x15   : > { %v2071_v19 = vld [vmem:[%s2171_s22 + $0x130] sm:$0xff]   ;;  %v2073_v21 = vld [vmem:[%s2171_s22 + $0x138] sm:$0xff]   ;;  %v2075_v23 = vld [vmem:[%s2171_s22 + $0x140] sm:$0xff]  }
  0x16   : > { %v2076_v24 = vld [vmem:[%s2171_s22 + $0x48] sm:$0xff]   ;;  %v2078_v26 = vld [vmem:[%s2171_s22 + $0x50] sm:$0xff]   ;;  %v2080_v28 = vld [vmem:[%s2171_s22 + $0x58] sm:$0xff]  }
  0x17   : > { %v2077_v25 = vld [vmem:[%s2171_s22 + $0x148] sm:$0xff]   ;;  %v2079_v27 = vld [vmem:[%s2171_s22 + $0x150] sm:$0xff]   ;;  %v2081_v29 = vld [vmem:[%s2171_s22 + $0x158] sm:$0xff]  }
  0x18   : > { %v2082_v30 = vld [vmem:[%s2171_s22 + $0x60] sm:$0xff]   ;;  %v2084_v32 = vld [vmem:[%s2171_s22 + $0x68] sm:$0xff]   ;;  %v2086_v34 = vld [vmem:[%s2171_s22 + $0x70] sm:$0xff]  }
  0x19   : > { %v2083_v31 = vld [vmem:[%s2171_s22 + $0x160] sm:$0xff]   ;;  %v2085_v33 = vld [vmem:[%s2171_s22 + $0x168] sm:$0xff]   ;;  %v2087_v35 = vld [vmem:[%s2171_s22 + $0x170] sm:$0xff]  }
  0x1a   : > { %1920 = vmatmul.mubr.msk.bf16.gmra.mrb[4].mxu0 %vm645_vm2, %v2064_v12  ;;  %v2088_v36 = vld [vmem:[%s2171_s22 + $0x78] sm:$0xff]   ;;  %v2090_v38 = vld [vmem:[%s2171_s22 + $0x80] sm:$0xff]   ;;  %v2092_v40 = vld [vmem:[%s2171_s22 + $0x88] sm:$0xff]  }
  0x1b   : > { %1984 = vmatmul.mubr.msk.bf16.gmra.mrb[4].mxu1 %vm645_vm2, %v2065_v13  ;;  %1923 = vmatprep.mubr.msk.bf16.mxu0 %vm645_vm2, %v2066_v14  ;;  %v2089_v37 = vld [vmem:[%s2171_s22 + $0x178] sm:$0xff]   ;;  %v2091_v39 = vld [vmem:[%s2171_s22 + $0x180] sm:$0xff]   ;;  %v2093_v41 = vld [vmem:[%s2171_s22 + $0x188] sm:$0xff]  }
  0x1c   : > { %1987 = vmatprep.mubr.msk.bf16.mxu1 %vm645_vm2, %v2067_v15  ;;  %v2094_v42 = vld [vmem:[%s2171_s22 + $0x90] sm:$0xff]   ;;  %v2096_v44 = vld [vmem:[%s2171_s22 + $0x98] sm:$0xff]   ;;  %v2098_v46 = vld [vmem:[%s2171_s22 + $0xa0] sm:$0xff]  }
  0x1d   : > { %v2095_v43 = vld [vmem:[%s2171_s22 + $0x190] sm:$0xff]   ;;  %v2097_v45 = vld [vmem:[%s2171_s22 + $0x198] sm:$0xff]   ;;  %v2099_v47 = vld [vmem:[%s2171_s22 + $0x1a0] sm:$0xff]  }
  0x1e   : > { %v2100_v48 = vld [vmem:[%s2171_s22 + $0xa8] sm:$0xff]   ;;  %v2102_v50 = vld [vmem:[%s2171_s22 + $0xb0] sm:$0xff]   ;;  %v2104_v52 = vld [vmem:[%s2171_s22 + $0xb8] sm:$0xff]  }
  0x1f   : > { %v2101_v49 = vld [vmem:[%s2171_s22 + $0x1a8] sm:$0xff]   ;;  %v2103_v51 = vld [vmem:[%s2171_s22 + $0x1b0] sm:$0xff]   ;;  %v2105_v53 = vld [vmem:[%s2171_s22 + $0x1b8] sm:$0xff]  }
  0x20   : > { %v2106_v54 = vld [vmem:[%s2171_s22 + $0xc0] sm:$0xff]   ;;  %v2108_v56 = vld [vmem:[%s2171_s22 + $0xc8] sm:$0xff]   ;;  %v2110_v58 = vld [vmem:[%s2171_s22 + $0xd0] sm:$0xff]  }
  0x21   : > { %v2107_v55 = vld [vmem:[%s2171_s22 + $0x1c0] sm:$0xff]   ;;  %v2109_v57 = vld [vmem:[%s2171_s22 + $0x1c8] sm:$0xff]   ;;  %v2111_v59 = vld [vmem:[%s2171_s22 + $0x1d0] sm:$0xff]  }
  0x22   : > { %1924 = vmatmul.mubr.msk.bf16.gmra.mrb[8].mxu0 %vm645_vm2, %v2068_v16  ;;  %v2112_v60 = vld [vmem:[%s2171_s22 + $0xd8] sm:$0xff]   ;;  %v2114_v62 = vld [vmem:[%s2171_s22 + $0xe0] sm:$0xff]   ;;  %v2116_v0 = vld [vmem:[%s2171_s22 + $0xe8] sm:$0xff]  }
  0x23   : > { %1988 = vmatmul.mubr.msk.bf16.gmra.mrb[8].mxu1 %vm645_vm2, %v2069_v17  ;;  %1927 = vmatprep.mubr.msk.bf16.mxu0 %vm645_vm2, %v2070_v18  ;;  %v2113_v61 = vld [vmem:[%s2171_s22 + $0x1d8] sm:$0xff]   ;;  %v2115_v63 = vld [vmem:[%s2171_s22 + $0x1e0] sm:$0xff]   ;;  %v2117_v1 = vld [vmem:[%s2171_s22 + $0x1e8] sm:$0xff]  }
  0x24   : > { %1991 = vmatprep.mubr.msk.bf16.mxu1 %vm645_vm2, %v2071_v19  ;;  %v2118_v2 = vld [vmem:[%s2171_s22 + $0xf0] sm:$0xff]   ;;  %v2120_v4 = vld [vmem:[%s2171_s22 + $0xf8] sm:$0xff]   ;;  %v2304_v6 = vld [vmem:[%s2701_s2] ss:$0 sm:$0xff] }
  0x25   : > { %v2119_v3 = vld [vmem:[%s2171_s22 + $0x1f0] sm:$0xff]   ;;  %v2121_v5 = vld [vmem:[%s2171_s22 + $0x1f8] sm:$0xff]  }
  0x2a   : > { %1928 = vmatmul.mubr.msk.bf16.gmra.mrb[12].mxu0 %vm645_vm2, %v2072_v20 }
  0x2b   : > { %1992 = vmatmul.mubr.msk.bf16.gmra.mrb[12].mxu1 %vm645_vm2, %v2073_v21  ;;  %1931 = vmatprep.mubr.msk.bf16.mxu0 %vm645_vm2, %v2074_v22 }
  0x2c   : > { %1995 = vmatprep.mubr.msk.bf16.mxu1 %vm645_vm2, %v2075_v23 }
  0x32   : > { %1932 = vmatmul.mubr.msk.bf16.gmra.mrb[16].mxu0 %vm645_vm2, %v2076_v24 }
  0x33   : > { %1996 = vmatmul.mubr.msk.bf16.gmra.mrb[16].mxu1 %vm645_vm2, %v2077_v25  ;;  %1935 = vmatprep.mubr.msk.bf16.mxu0 %vm645_vm2, %v2078_v26 }
  0x34   : > { %1999 = vmatprep.mubr.msk.bf16.mxu1 %vm645_vm2, %v2079_v27 }
  0x3a   : > { %1936 = vmatmul.mubr.msk.bf16.gmra.mrb[20].mxu0 %vm645_vm2, %v2080_v28 }
  0x3b   : > { %2000 = vmatmul.mubr.msk.bf16.gmra.mrb[20].mxu1 %vm645_vm2, %v2081_v29  ;;  %1939 = vmatprep.mubr.msk.bf16.mxu0 %vm645_vm2, %v2082_v30 }
  0x3c   : > { %2003 = vmatprep.mubr.msk.bf16.mxu1 %vm645_vm2, %v2083_v31 }
  0x42   : > { %1940 = vmatmul.mubr.msk.bf16.gmra.mrb[24].mxu0 %vm645_vm2, %v2084_v32 }
  0x43   : > { %2004 = vmatmul.mubr.msk.bf16.gmra.mrb[24].mxu1 %vm645_vm2, %v2085_v33  ;;  %1943 = vmatprep.mubr.msk.bf16.mxu0 %vm645_vm2, %v2086_v34 }
  0x44   : > { %2007 = vmatprep.mubr.msk.bf16.mxu1 %vm645_vm2, %v2087_v35 }
  0x4a   : > { %1944 = vmatmul.mubr.msk.bf16.gmra.mrb[28].mxu0 %vm645_vm2, %v2088_v36 }
  0x4b   : > { %2008 = vmatmul.mubr.msk.bf16.gmra.mrb[28].mxu1 %vm645_vm2, %v2089_v37  ;;  %1947 = vmatprep.mubr.msk.bf16.mxu0 %vm645_vm2, %v2090_v38 }
  0x4c   : > { %2011 = vmatprep.mubr.msk.bf16.mxu1 %vm645_vm2, %v2091_v39 }
  0x52   : > { %1948 = vmatmul.mubr.msk.bf16.gmra.mrb[32].mxu0 %vm645_vm2, %v2092_v40 }
  0x53   : > { %2012 = vmatmul.mubr.msk.bf16.gmra.mrb[32].mxu1 %vm645_vm2, %v2093_v41  ;;  %1951 = vmatprep.mubr.msk.bf16.mxu0 %vm645_vm2, %v2094_v42 }
  0x54   : > { %2015 = vmatprep.mubr.msk.bf16.mxu1 %vm645_vm2, %v2095_v43 }
  0x5a   : > { %1952 = vmatmul.mubr.msk.bf16.gmra.mrb[36].mxu0 %vm645_vm2, %v2096_v44 }
  0x5b   : > { %2016 = vmatmul.mubr.msk.bf16.gmra.mrb[36].mxu1 %vm645_vm2, %v2097_v45  ;;  %1955 = vmatprep.mubr.msk.bf16.mxu0 %vm645_vm2, %v2098_v46 }
  0x5c   : > { %2019 = vmatprep.mubr.msk.bf16.mxu1 %vm645_vm2, %v2099_v47 }
  0x62   : > { %1956 = vmatmul.mubr.msk.bf16.gmra.mrb[40].mxu0 %vm645_vm2, %v2100_v48 }
  0x63   : > { %2020 = vmatmul.mubr.msk.bf16.gmra.mrb[40].mxu1 %vm645_vm2, %v2101_v49  ;;  %1959 = vmatprep.mubr.msk.bf16.mxu0 %vm645_vm2, %v2102_v50 }
  0x64   : > { %2023 = vmatprep.mubr.msk.bf16.mxu1 %vm645_vm2, %v2103_v51 }
  0x6a   : > { %1960 = vmatmul.mubr.msk.bf16.gmra.mrb[44].mxu0 %vm645_vm2, %v2104_v52 }
  0x6b   : > { %2024 = vmatmul.mubr.msk.bf16.gmra.mrb[44].mxu1 %vm645_vm2, %v2105_v53  ;;  %1963 = vmatprep.mubr.msk.bf16.mxu0 %vm645_vm2, %v2106_v54 }
  0x6c   : > { %2027 = vmatprep.mubr.msk.bf16.mxu1 %vm645_vm2, %v2107_v55 }
  0x72   : > { %1964 = vmatmul.mubr.msk.bf16.gmra.mrb[48].mxu0 %vm645_vm2, %v2108_v56 }
  0x73   : > { %2028 = vmatmul.mubr.msk.bf16.gmra.mrb[48].mxu1 %vm645_vm2, %v2109_v57  ;;  %1967 = vmatprep.mubr.msk.bf16.mxu0 %vm645_vm2, %v2110_v58 }
  0x74   : > { %2031 = vmatprep.mubr.msk.bf16.mxu1 %vm645_vm2, %v2111_v59 }
  0x7a   : > { %1968 = vmatmul.mubr.msk.bf16.gmra.mrb[52].mxu0 %vm645_vm2, %v2112_v60 }
  0x7b   : > { %2032 = vmatmul.mubr.msk.bf16.gmra.mrb[52].mxu1 %vm645_vm2, %v2113_v61  ;;  %1971 = vmatprep.mubr.msk.bf16.mxu0 %vm645_vm2, %v2114_v62 }
  0x7c   : > { %2035 = vmatprep.mubr.msk.bf16.mxu1 %vm645_vm2, %v2115_v63 }
  0x82   : > { %1972 = vmatmul.mubr.msk.bf16.gmra.mrb[56].mxu0 %vm645_vm2, %v2116_v0 }
  0x83   : > { %2036 = vmatmul.mubr.msk.bf16.gmra.mrb[56].mxu1 %vm645_vm2, %v2117_v1  ;;  %1975 = vmatprep.mubr.msk.bf16.mxu0 %vm645_vm2, %v2118_v2 }
  0x84   : > { %2039 = vmatprep.mubr.msk.bf16.mxu1 %vm645_vm2, %v2119_v3 }
  0x8a   : > { %1976 = vmatmul.mubr.msk.bf16.gmra.mrb[60].mxu0 %vm645_vm2, %v2120_v4 }
  0x8b   : > { %2040 = vmatmul.mubr.msk.bf16.gmra.mrb[60].mxu1 %vm645_vm2, %v2121_v5 }
  0xe5   : > { %v1917_v7 = vpop.f32.mrb[0].mxu0 }
  0xe6   : > { %v888_v8 = vadd.f32 %v1917_v7, %v2304_v6  ;;  %v1981_v9 = vpop.f32.mrb[0].mxu1  ;;  %v879_v10 = vpop.f32.mrb[1].mxu0 }
  0xe7   : > { %v1144_v11 = vadd.f32 %v1981_v9, %v2304_v6  ;;  %v880_v12 = vadd.f32 %v2304_v6, %v879_v10  ;;  %v1135_v13 = vpop.f32.mrb[1].mxu1  ;;  %v1918_v14 = vpop.f32.mrb[2].mxu0 }
  0xe8   : > { %v1392_v15 = vmax.f32 %v888_v8, 0.0  ;;  %v1136_v16 = vadd.f32 %v2304_v6, %v1135_v13  ;;  %v891_v17 = vadd.f32 %v1918_v14, %v2304_v6  ;;  %v1982_v18 = vpop.f32.mrb[2].mxu1  ;;  %v882_v19 = vpop.f32.mrb[3].mxu0 }
  0xe9   : > { %v1456_v20 = vmax.f32 %v1144_v11, 0.0  ;;  %v1390_v21 = vmax.f32 %v880_v12, 0.0  ;;  %v1147_v22 = vadd.f32 %v1982_v18, %v2304_v6  ;;  %v883_v23 = vadd.f32 %v2304_v6, %v882_v19  ;;  %v1138_v24 = vpop.f32.mrb[3].mxu1 }
  0xea   : > { %1521 = vst.msk [vmem:[%s2311_s28 + $0x10] sm:$0xff] %vm1518_vm3, %v1392_v15  ;;  %v1454_v25 = vmax.f32 %v1136_v16, 0.0  ;;  %v1393_v26 = vmax.f32 %v891_v17, 0.0  ;;  %v1139_v27 = vadd.f32 %v2304_v6, %v1138_v24 }
  0xeb   : > { %1585 = vst.msk [vmem:[%s2311_s28 + $0x210] sm:$0xff] %vm1518_vm3, %v1456_v20  ;;  %1519 = vst.msk [vmem:[%s2311_s28] sm:$0xff] %vm1518_vm3, %v1390_v21  ;;  %v1457_v28 = vmax.f32 %v1147_v22, 0.0  ;;  %v1391_v29 = vmax.f32 %v883_v23, 0.0 }
  0xec   : > { %1583 = vst.msk [vmem:[%s2311_s28 + $0x200] sm:$0xff] %vm1518_vm3, %v1454_v25  ;;  %1522 = vst.msk [vmem:[%s2311_s28 + $0x18] sm:$0xff] %vm1518_vm3, %v1393_v26  ;;  %v1455_v30 = vmax.f32 %v1139_v27, 0.0 }
  0xed   : > { %1586 = vst.msk [vmem:[%s2311_s28 + $0x218] sm:$0xff] %vm1518_vm3, %v1457_v28  ;;  %1520 = vst.msk [vmem:[%s2311_s28 + $0x8] sm:$0xff] %vm1518_vm3, %v1391_v29  ;;  %v1921_v31 = vpop.f32.mrb[4].mxu0 }
  0xee   : > { %1584 = vst.msk [vmem:[%s2311_s28 + $0x208] sm:$0xff] %vm1518_vm3, %v1455_v30  ;;  %v904_v32 = vadd.f32 %v1921_v31, %v2304_v6  ;;  %v1985_v33 = vpop.f32.mrb[4].mxu1  ;;  %v895_v34 = vpop.f32.mrb[5].mxu0 }
  0xef   : > { %v1160_v35 = vadd.f32 %v1985_v33, %v2304_v6  ;;  %v896_v36 = vadd.f32 %v2304_v6, %v895_v34  ;;  %v1151_v37 = vpop.f32.mrb[5].mxu1  ;;  %v1922_v38 = vpop.f32.mrb[6].mxu0 }
  0xf0   : > { %v1396_v39 = vmax.f32 %v904_v32, 0.0  ;;  %v1152_v40 = vadd.f32 %v2304_v6, %v1151_v37  ;;  %v907_v41 = vadd.f32 %v1922_v38, %v2304_v6  ;;  %v1986_v42 = vpop.f32.mrb[6].mxu1  ;;  %v898_v43 = vpop.f32.mrb[7].mxu0 }
  0xf1   : > { %v1460_v44 = vmax.f32 %v1160_v35, 0.0  ;;  %v1394_v45 = vmax.f32 %v896_v36, 0.0  ;;  %v1163_v46 = vadd.f32 %v1986_v42, %v2304_v6  ;;  %v899_v47 = vadd.f32 %v2304_v6, %v898_v43  ;;  %v1154_v48 = vpop.f32.mrb[7].mxu1 }
  0xf2   : > { %1525 = vst.msk [vmem:[%s2311_s28 + $0x30] sm:$0xff] %vm1518_vm3, %v1396_v39  ;;  %v1458_v49 = vmax.f32 %v1152_v40, 0.0  ;;  %v1397_v50 = vmax.f32 %v907_v41, 0.0  ;;  %v1155_v51 = vadd.f32 %v2304_v6, %v1154_v48 }
  0xf3   : > { %1589 = vst.msk [vmem:[%s2311_s28 + $0x230] sm:$0xff] %vm1518_vm3, %v1460_v44  ;;  %1523 = vst.msk [vmem:[%s2311_s28 + $0x20] sm:$0xff] %vm1518_vm3, %v1394_v45  ;;  %v1461_v52 = vmax.f32 %v1163_v46, 0.0  ;;  %v1395_v53 = vmax.f32 %v899_v47, 0.0 }
  0xf4   : > { %1587 = vst.msk [vmem:[%s2311_s28 + $0x220] sm:$0xff] %vm1518_vm3, %v1458_v49  ;;  %1526 = vst.msk [vmem:[%s2311_s28 + $0x38] sm:$0xff] %vm1518_vm3, %v1397_v50  ;;  %v1459_v54 = vmax.f32 %v1155_v51, 0.0 }
  0xf5   : > { %1590 = vst.msk [vmem:[%s2311_s28 + $0x238] sm:$0xff] %vm1518_vm3, %v1461_v52  ;;  %1524 = vst.msk [vmem:[%s2311_s28 + $0x28] sm:$0xff] %vm1518_vm3, %v1395_v53  ;;  %v1925_v55 = vpop.f32.mrb[8].mxu0 }
  0xf6   : > { %1588 = vst.msk [vmem:[%s2311_s28 + $0x228] sm:$0xff] %vm1518_vm3, %v1459_v54  ;;  %v920_v56 = vadd.f32 %v1925_v55, %v2304_v6  ;;  %v1989_v57 = vpop.f32.mrb[8].mxu1  ;;  %v911_v58 = vpop.f32.mrb[9].mxu0 }
  0xf7   : > { %v1176_v59 = vadd.f32 %v1989_v57, %v2304_v6  ;;  %v912_v60 = vadd.f32 %v2304_v6, %v911_v58  ;;  %v1167_v61 = vpop.f32.mrb[9].mxu1  ;;  %v1926_v62 = vpop.f32.mrb[10].mxu0 }
  0xf8   : > { %v1400_v63 = vmax.f32 %v920_v56, 0.0  ;;  %v1168_v0 = vadd.f32 %v2304_v6, %v1167_v61  ;;  %v923_v1 = vadd.f32 %v1926_v62, %v2304_v6  ;;  %v1990_v2 = vpop.f32.mrb[10].mxu1  ;;  %v914_v3 = vpop.f32.mrb[11].mxu0 }
  0xf9   : > { %v1464_v4 = vmax.f32 %v1176_v59, 0.0  ;;  %v1398_v5 = vmax.f32 %v912_v60, 0.0  ;;  %v1179_v7 = vadd.f32 %v1990_v2, %v2304_v6  ;;  %v915_v8 = vadd.f32 %v2304_v6, %v914_v3  ;;  %v1170_v9 = vpop.f32.mrb[11].mxu1 }
  0xfa   : > { %1529 = vst.msk [vmem:[%s2311_s28 + $0x50] sm:$0xff] %vm1518_vm3, %v1400_v63  ;;  %v1462_v10 = vmax.f32 %v1168_v0, 0.0  ;;  %v1401_v11 = vmax.f32 %v923_v1, 0.0  ;;  %v1171_v12 = vadd.f32 %v2304_v6, %v1170_v9 }
  0xfb   : > { %1593 = vst.msk [vmem:[%s2311_s28 + $0x250] sm:$0xff] %vm1518_vm3, %v1464_v4  ;;  %1527 = vst.msk [vmem:[%s2311_s28 + $0x40] sm:$0xff] %vm1518_vm3, %v1398_v5  ;;  %v1465_v13 = vmax.f32 %v1179_v7, 0.0  ;;  %v1399_v14 = vmax.f32 %v915_v8, 0.0 }
  0xfc   : > { %1591 = vst.msk [vmem:[%s2311_s28 + $0x240] sm:$0xff] %vm1518_vm3, %v1462_v10  ;;  %1530 = vst.msk [vmem:[%s2311_s28 + $0x58] sm:$0xff] %vm1518_vm3, %v1401_v11  ;;  %v1463_v15 = vmax.f32 %v1171_v12, 0.0 }
  0xfd   : > { %1594 = vst.msk [vmem:[%s2311_s28 + $0x258] sm:$0xff] %vm1518_vm3, %v1465_v13  ;;  %1528 = vst.msk [vmem:[%s2311_s28 + $0x48] sm:$0xff] %vm1518_vm3, %v1399_v14  ;;  %v1929_v16 = vpop.f32.mrb[12].mxu0 }
  0xfe   : > { %1592 = vst.msk [vmem:[%s2311_s28 + $0x248] sm:$0xff] %vm1518_vm3, %v1463_v15  ;;  %v936_v17 = vadd.f32 %v1929_v16, %v2304_v6  ;;  %v1993_v18 = vpop.f32.mrb[12].mxu1  ;;  %v927_v19 = vpop.f32.mrb[13].mxu0 }
  0xff   : > { %v1192_v20 = vadd.f32 %v1993_v18, %v2304_v6  ;;  %v928_v21 = vadd.f32 %v2304_v6, %v927_v19  ;;  %v1183_v22 = vpop.f32.mrb[13].mxu1  ;;  %v1930_v23 = vpop.f32.mrb[14].mxu0 }
 0x100   : > { %v1404_v24 = vmax.f32 %v936_v17, 0.0  ;;  %v1184_v25 = vadd.f32 %v2304_v6, %v1183_v22  ;;  %v939_v26 = vadd.f32 %v1930_v23, %v2304_v6  ;;  %v1994_v27 = vpop.f32.mrb[14].mxu1  ;;  %v930_v28 = vpop.f32.mrb[15].mxu0 }
 0x101   : > { %v1468_v29 = vmax.f32 %v1192_v20, 0.0  ;;  %v1402_v30 = vmax.f32 %v928_v21, 0.0  ;;  %v1195_v31 = vadd.f32 %v1994_v27, %v2304_v6  ;;  %v931_v32 = vadd.f32 %v2304_v6, %v930_v28  ;;  %v1186_v33 = vpop.f32.mrb[15].mxu1 }
 0x102   : > { %1533 = vst.msk [vmem:[%s2311_s28 + $0x70] sm:$0xff] %vm1518_vm3, %v1404_v24  ;;  %v1466_v34 = vmax.f32 %v1184_v25, 0.0  ;;  %v1405_v35 = vmax.f32 %v939_v26, 0.0  ;;  %v1187_v36 = vadd.f32 %v2304_v6, %v1186_v33 }
 0x103   : > { %1597 = vst.msk [vmem:[%s2311_s28 + $0x270] sm:$0xff] %vm1518_vm3, %v1468_v29  ;;  %1531 = vst.msk [vmem:[%s2311_s28 + $0x60] sm:$0xff] %vm1518_vm3, %v1402_v30  ;;  %v1469_v37 = vmax.f32 %v1195_v31, 0.0  ;;  %v1403_v38 = vmax.f32 %v931_v32, 0.0 }
 0x104   : > { %1595 = vst.msk [vmem:[%s2311_s28 + $0x260] sm:$0xff] %vm1518_vm3, %v1466_v34  ;;  %1534 = vst.msk [vmem:[%s2311_s28 + $0x78] sm:$0xff] %vm1518_vm3, %v1405_v35  ;;  %v1467_v39 = vmax.f32 %v1187_v36, 0.0 }
 0x105   : > { %1598 = vst.msk [vmem:[%s2311_s28 + $0x278] sm:$0xff] %vm1518_vm3, %v1469_v37  ;;  %1532 = vst.msk [vmem:[%s2311_s28 + $0x68] sm:$0xff] %vm1518_vm3, %v1403_v38  ;;  %v1933_v40 = vpop.f32.mrb[16].mxu0 }
 0x106   : > { %1596 = vst.msk [vmem:[%s2311_s28 + $0x268] sm:$0xff] %vm1518_vm3, %v1467_v39  ;;  %v952_v41 = vadd.f32 %v1933_v40, %v2304_v6  ;;  %v1997_v42 = vpop.f32.mrb[16].mxu1  ;;  %v943_v43 = vpop.f32.mrb[17].mxu0 }
 0x107   : > { %v1208_v44 = vadd.f32 %v1997_v42, %v2304_v6  ;;  %v944_v45 = vadd.f32 %v2304_v6, %v943_v43  ;;  %v1199_v46 = vpop.f32.mrb[17].mxu1  ;;  %v1934_v47 = vpop.f32.mrb[18].mxu0 }
 0x108   : > { %v1408_v48 = vmax.f32 %v952_v41, 0.0  ;;  %v1200_v49 = vadd.f32 %v2304_v6, %v1199_v46  ;;  %v955_v50 = vadd.f32 %v1934_v47, %v2304_v6  ;;  %v1998_v51 = vpop.f32.mrb[18].mxu1  ;;  %v946_v52 = vpop.f32.mrb[19].mxu0 }
 0x109   : > { %v1472_v53 = vmax.f32 %v1208_v44, 0.0  ;;  %v1406_v54 = vmax.f32 %v944_v45, 0.0  ;;  %v1211_v55 = vadd.f32 %v1998_v51, %v2304_v6  ;;  %v947_v56 = vadd.f32 %v2304_v6, %v946_v52  ;;  %v1202_v57 = vpop.f32.mrb[19].mxu1 }
 0x10a   : > { %1537 = vst.msk [vmem:[%s2311_s28 + $0x90] sm:$0xff] %vm1518_vm3, %v1408_v48  ;;  %v1470_v58 = vmax.f32 %v1200_v49, 0.0  ;;  %v1409_v59 = vmax.f32 %v955_v50, 0.0  ;;  %v1203_v60 = vadd.f32 %v2304_v6, %v1202_v57 }
 0x10b   : > { %1601 = vst.msk [vmem:[%s2311_s28 + $0x290] sm:$0xff] %vm1518_vm3, %v1472_v53  ;;  %1535 = vst.msk [vmem:[%s2311_s28 + $0x80] sm:$0xff] %vm1518_vm3, %v1406_v54  ;;  %v1473_v61 = vmax.f32 %v1211_v55, 0.0  ;;  %v1407_v62 = vmax.f32 %v947_v56, 0.0 }
 0x10c   : > { %1599 = vst.msk [vmem:[%s2311_s28 + $0x280] sm:$0xff] %vm1518_vm3, %v1470_v58  ;;  %1538 = vst.msk [vmem:[%s2311_s28 + $0x98] sm:$0xff] %vm1518_vm3, %v1409_v59  ;;  %v1471_v63 = vmax.f32 %v1203_v60, 0.0 }
 0x10d   : > { %1602 = vst.msk [vmem:[%s2311_s28 + $0x298] sm:$0xff] %vm1518_vm3, %v1473_v61  ;;  %1536 = vst.msk [vmem:[%s2311_s28 + $0x88] sm:$0xff] %vm1518_vm3, %v1407_v62  ;;  %v1937_v0 = vpop.f32.mrb[20].mxu0 }
 0x10e   : > { %1600 = vst.msk [vmem:[%s2311_s28 + $0x288] sm:$0xff] %vm1518_vm3, %v1471_v63  ;;  %v968_v1 = vadd.f32 %v1937_v0, %v2304_v6  ;;  %v2001_v2 = vpop.f32.mrb[20].mxu1  ;;  %v959_v3 = vpop.f32.mrb[21].mxu0 }
 0x10f   : > { %v1224_v4 = vadd.f32 %v2001_v2, %v2304_v6  ;;  %v960_v5 = vadd.f32 %v2304_v6, %v959_v3  ;;  %v1215_v7 = vpop.f32.mrb[21].mxu1  ;;  %v1938_v8 = vpop.f32.mrb[22].mxu0 }
 0x110   : > { %v1412_v9 = vmax.f32 %v968_v1, 0.0  ;;  %v1216_v10 = vadd.f32 %v2304_v6, %v1215_v7  ;;  %v971_v11 = vadd.f32 %v1938_v8, %v2304_v6  ;;  %v2002_v12 = vpop.f32.mrb[22].mxu1  ;;  %v962_v13 = vpop.f32.mrb[23].mxu0 }
 0x111   : > { %v1476_v14 = vmax.f32 %v1224_v4, 0.0  ;;  %v1410_v15 = vmax.f32 %v960_v5, 0.0  ;;  %v1227_v16 = vadd.f32 %v2002_v12, %v2304_v6  ;;  %v963_v17 = vadd.f32 %v2304_v6, %v962_v13  ;;  %v1218_v18 = vpop.f32.mrb[23].mxu1 }
 0x112   : > { %1541 = vst.msk [vmem:[%s2311_s28 + $0xb0] sm:$0xff] %vm1518_vm3, %v1412_v9  ;;  %v1474_v19 = vmax.f32 %v1216_v10, 0.0  ;;  %v1413_v20 = vmax.f32 %v971_v11, 0.0  ;;  %v1219_v21 = vadd.f32 %v2304_v6, %v1218_v18 }
 0x113   : > { %1605 = vst.msk [vmem:[%s2311_s28 + $0x2b0] sm:$0xff] %vm1518_vm3, %v1476_v14  ;;  %1539 = vst.msk [vmem:[%s2311_s28 + $0xa0] sm:$0xff] %vm1518_vm3, %v1410_v15  ;;  %v1477_v22 = vmax.f32 %v1227_v16, 0.0  ;;  %v1411_v23 = vmax.f32 %v963_v17, 0.0 }
 0x114   : > { %1603 = vst.msk [vmem:[%s2311_s28 + $0x2a0] sm:$0xff] %vm1518_vm3, %v1474_v19  ;;  %1542 = vst.msk [vmem:[%s2311_s28 + $0xb8] sm:$0xff] %vm1518_vm3, %v1413_v20  ;;  %v1475_v24 = vmax.f32 %v1219_v21, 0.0 }
 0x115   : > { %1606 = vst.msk [vmem:[%s2311_s28 + $0x2b8] sm:$0xff] %vm1518_vm3, %v1477_v22  ;;  %1540 = vst.msk [vmem:[%s2311_s28 + $0xa8] sm:$0xff] %vm1518_vm3, %v1411_v23  ;;  %v1941_v25 = vpop.f32.mrb[24].mxu0 }
 0x116   : > { %1604 = vst.msk [vmem:[%s2311_s28 + $0x2a8] sm:$0xff] %vm1518_vm3, %v1475_v24  ;;  %v984_v26 = vadd.f32 %v1941_v25, %v2304_v6  ;;  %v2005_v27 = vpop.f32.mrb[24].mxu1  ;;  %v975_v28 = vpop.f32.mrb[25].mxu0 }
 0x117   : > { %v1240_v29 = vadd.f32 %v2005_v27, %v2304_v6  ;;  %v976_v30 = vadd.f32 %v2304_v6, %v975_v28  ;;  %v1231_v31 = vpop.f32.mrb[25].mxu1  ;;  %v1942_v32 = vpop.f32.mrb[26].mxu0 }
 0x118   : > { %v1416_v33 = vmax.f32 %v984_v26, 0.0  ;;  %v1232_v34 = vadd.f32 %v2304_v6, %v1231_v31  ;;  %v987_v35 = vadd.f32 %v1942_v32, %v2304_v6  ;;  %v2006_v36 = vpop.f32.mrb[26].mxu1  ;;  %v978_v37 = vpop.f32.mrb[27].mxu0 }
 0x119   : > { %v1480_v38 = vmax.f32 %v1240_v29, 0.0  ;;  %v1414_v39 = vmax.f32 %v976_v30, 0.0  ;;  %v1243_v40 = vadd.f32 %v2006_v36, %v2304_v6  ;;  %v979_v41 = vadd.f32 %v2304_v6, %v978_v37  ;;  %v1234_v42 = vpop.f32.mrb[27].mxu1 }
 0x11a   : > { %1545 = vst.msk [vmem:[%s2311_s28 + $0xd0] sm:$0xff] %vm1518_vm3, %v1416_v33  ;;  %v1478_v43 = vmax.f32 %v1232_v34, 0.0  ;;  %v1417_v44 = vmax.f32 %v987_v35, 0.0  ;;  %v1235_v45 = vadd.f32 %v2304_v6, %v1234_v42 }
 0x11b   : > { %1609 = vst.msk [vmem:[%s2311_s28 + $0x2d0] sm:$0xff] %vm1518_vm3, %v1480_v38  ;;  %1543 = vst.msk [vmem:[%s2311_s28 + $0xc0] sm:$0xff] %vm1518_vm3, %v1414_v39  ;;  %v1481_v46 = vmax.f32 %v1243_v40, 0.0  ;;  %v1415_v47 = vmax.f32 %v979_v41, 0.0 }
 0x11c   : > { %1607 = vst.msk [vmem:[%s2311_s28 + $0x2c0] sm:$0xff] %vm1518_vm3, %v1478_v43  ;;  %1546 = vst.msk [vmem:[%s2311_s28 + $0xd8] sm:$0xff] %vm1518_vm3, %v1417_v44  ;;  %v1479_v48 = vmax.f32 %v1235_v45, 0.0 }
 0x11d   : > { %1610 = vst.msk [vmem:[%s2311_s28 + $0x2d8] sm:$0xff] %vm1518_vm3, %v1481_v46  ;;  %1544 = vst.msk [vmem:[%s2311_s28 + $0xc8] sm:$0xff] %vm1518_vm3, %v1415_v47  ;;  %v1945_v49 = vpop.f32.mrb[28].mxu0 }
 0x11e   : > { %1608 = vst.msk [vmem:[%s2311_s28 + $0x2c8] sm:$0xff] %vm1518_vm3, %v1479_v48  ;;  %v1000_v50 = vadd.f32 %v1945_v49, %v2304_v6  ;;  %v2009_v51 = vpop.f32.mrb[28].mxu1  ;;  %v991_v52 = vpop.f32.mrb[29].mxu0 }
 0x11f   : > { %v1256_v53 = vadd.f32 %v2009_v51, %v2304_v6  ;;  %v992_v54 = vadd.f32 %v2304_v6, %v991_v52  ;;  %v1247_v55 = vpop.f32.mrb[29].mxu1  ;;  %v1946_v56 = vpop.f32.mrb[30].mxu0 }
 0x120   : > { %v1420_v57 = vmax.f32 %v1000_v50, 0.0  ;;  %v1248_v58 = vadd.f32 %v2304_v6, %v1247_v55  ;;  %v1003_v59 = vadd.f32 %v1946_v56, %v2304_v6  ;;  %v2010_v60 = vpop.f32.mrb[30].mxu1  ;;  %v994_v61 = vpop.f32.mrb[31].mxu0 }
 0x121   : > { %v1484_v62 = vmax.f32 %v1256_v53, 0.0  ;;  %v1418_v63 = vmax.f32 %v992_v54, 0.0  ;;  %v1259_v0 = vadd.f32 %v2010_v60, %v2304_v6  ;;  %v995_v1 = vadd.f32 %v2304_v6, %v994_v61  ;;  %v1250_v2 = vpop.f32.mrb[31].mxu1 }
 0x122   : > { %1549 = vst.msk [vmem:[%s2311_s28 + $0xf0] sm:$0xff] %vm1518_vm3, %v1420_v57  ;;  %v1482_v3 = vmax.f32 %v1248_v58, 0.0  ;;  %v1421_v4 = vmax.f32 %v1003_v59, 0.0  ;;  %v1251_v5 = vadd.f32 %v2304_v6, %v1250_v2 }
 0x123   : > { %1613 = vst.msk [vmem:[%s2311_s28 + $0x2f0] sm:$0xff] %vm1518_vm3, %v1484_v62  ;;  %1547 = vst.msk [vmem:[%s2311_s28 + $0xe0] sm:$0xff] %vm1518_vm3, %v1418_v63  ;;  %v1485_v7 = vmax.f32 %v1259_v0, 0.0  ;;  %v1419_v8 = vmax.f32 %v995_v1, 0.0 }
 0x124   : > { %1611 = vst.msk [vmem:[%s2311_s28 + $0x2e0] sm:$0xff] %vm1518_vm3, %v1482_v3  ;;  %1550 = vst.msk [vmem:[%s2311_s28 + $0xf8] sm:$0xff] %vm1518_vm3, %v1421_v4  ;;  %v1483_v9 = vmax.f32 %v1251_v5, 0.0 }
 0x125   : > { %1614 = vst.msk [vmem:[%s2311_s28 + $0x2f8] sm:$0xff] %vm1518_vm3, %v1485_v7  ;;  %1548 = vst.msk [vmem:[%s2311_s28 + $0xe8] sm:$0xff] %vm1518_vm3, %v1419_v8  ;;  %v1949_v10 = vpop.f32.mrb[32].mxu0 }
 0x126   : > { %1612 = vst.msk [vmem:[%s2311_s28 + $0x2e8] sm:$0xff] %vm1518_vm3, %v1483_v9  ;;  %v1016_v11 = vadd.f32 %v1949_v10, %v2304_v6  ;;  %v2013_v12 = vpop.f32.mrb[32].mxu1  ;;  %v1007_v13 = vpop.f32.mrb[33].mxu0 }
 0x127   : > { %v1272_v14 = vadd.f32 %v2013_v12, %v2304_v6  ;;  %v1008_v15 = vadd.f32 %v2304_v6, %v1007_v13  ;;  %v1263_v16 = vpop.f32.mrb[33].mxu1  ;;  %v1950_v17 = vpop.f32.mrb[34].mxu0 }
 0x128   : > { %v1424_v18 = vmax.f32 %v1016_v11, 0.0  ;;  %v1264_v19 = vadd.f32 %v2304_v6, %v1263_v16  ;;  %v1019_v20 = vadd.f32 %v1950_v17, %v2304_v6  ;;  %v2014_v21 = vpop.f32.mrb[34].mxu1  ;;  %v1010_v22 = vpop.f32.mrb[35].mxu0 }
 0x129   : > { %v1488_v23 = vmax.f32 %v1272_v14, 0.0  ;;  %v1422_v24 = vmax.f32 %v1008_v15, 0.0  ;;  %v1275_v25 = vadd.f32 %v2014_v21, %v2304_v6  ;;  %v1011_v26 = vadd.f32 %v2304_v6, %v1010_v22  ;;  %v1266_v27 = vpop.f32.mrb[35].mxu1 }
 0x12a   : > { %1553 = vst.msk [vmem:[%s2311_s28 + $0x110] sm:$0xff] %vm1518_vm3, %v1424_v18  ;;  %v1486_v28 = vmax.f32 %v1264_v19, 0.0  ;;  %v1425_v29 = vmax.f32 %v1019_v20, 0.0  ;;  %v1267_v30 = vadd.f32 %v2304_v6, %v1266_v27 }
 0x12b   : > { %1617 = vst.msk [vmem:[%s2311_s28 + $0x310] sm:$0xff] %vm1518_vm3, %v1488_v23  ;;  %1551 = vst.msk [vmem:[%s2311_s28 + $0x100] sm:$0xff] %vm1518_vm3, %v1422_v24  ;;  %v1489_v31 = vmax.f32 %v1275_v25, 0.0  ;;  %v1423_v32 = vmax.f32 %v1011_v26, 0.0 }
 0x12c   : > { %1615 = vst.msk [vmem:[%s2311_s28 + $0x300] sm:$0xff] %vm1518_vm3, %v1486_v28  ;;  %1554 = vst.msk [vmem:[%s2311_s28 + $0x118] sm:$0xff] %vm1518_vm3, %v1425_v29  ;;  %v1487_v33 = vmax.f32 %v1267_v30, 0.0 }
 0x12d   : > { %1618 = vst.msk [vmem:[%s2311_s28 + $0x318] sm:$0xff] %vm1518_vm3, %v1489_v31  ;;  %1552 = vst.msk [vmem:[%s2311_s28 + $0x108] sm:$0xff] %vm1518_vm3, %v1423_v32  ;;  %v1953_v34 = vpop.f32.mrb[36].mxu0 }
 0x12e   : > { %1616 = vst.msk [vmem:[%s2311_s28 + $0x308] sm:$0xff] %vm1518_vm3, %v1487_v33  ;;  %v1032_v35 = vadd.f32 %v1953_v34, %v2304_v6  ;;  %v2017_v36 = vpop.f32.mrb[36].mxu1  ;;  %v1023_v37 = vpop.f32.mrb[37].mxu0 }
 0x12f   : > { %v1288_v38 = vadd.f32 %v2017_v36, %v2304_v6  ;;  %v1024_v39 = vadd.f32 %v2304_v6, %v1023_v37  ;;  %v1279_v40 = vpop.f32.mrb[37].mxu1  ;;  %v1954_v41 = vpop.f32.mrb[38].mxu0 }
 0x130   : > { %v1428_v42 = vmax.f32 %v1032_v35, 0.0  ;;  %v1280_v43 = vadd.f32 %v2304_v6, %v1279_v40  ;;  %v1035_v44 = vadd.f32 %v1954_v41, %v2304_v6  ;;  %v2018_v45 = vpop.f32.mrb[38].mxu1  ;;  %v1026_v46 = vpop.f32.mrb[39].mxu0 }
 0x131   : > { %v1492_v47 = vmax.f32 %v1288_v38, 0.0  ;;  %v1426_v48 = vmax.f32 %v1024_v39, 0.0  ;;  %v1291_v49 = vadd.f32 %v2018_v45, %v2304_v6  ;;  %v1027_v50 = vadd.f32 %v2304_v6, %v1026_v46  ;;  %v1282_v51 = vpop.f32.mrb[39].mxu1 }
 0x132   : > { %1557 = vst.msk [vmem:[%s2311_s28 + $0x130] sm:$0xff] %vm1518_vm3, %v1428_v42  ;;  %v1490_v52 = vmax.f32 %v1280_v43, 0.0  ;;  %v1429_v53 = vmax.f32 %v1035_v44, 0.0  ;;  %v1283_v54 = vadd.f32 %v2304_v6, %v1282_v51 }
 0x133   : > { %1621 = vst.msk [vmem:[%s2311_s28 + $0x330] sm:$0xff] %vm1518_vm3, %v1492_v47  ;;  %1555 = vst.msk [vmem:[%s2311_s28 + $0x120] sm:$0xff] %vm1518_vm3, %v1426_v48  ;;  %v1493_v55 = vmax.f32 %v1291_v49, 0.0  ;;  %v1427_v56 = vmax.f32 %v1027_v50, 0.0 }
 0x134   : > { %1619 = vst.msk [vmem:[%s2311_s28 + $0x320] sm:$0xff] %vm1518_vm3, %v1490_v52  ;;  %1558 = vst.msk [vmem:[%s2311_s28 + $0x138] sm:$0xff] %vm1518_vm3, %v1429_v53  ;;  %v1491_v57 = vmax.f32 %v1283_v54, 0.0 }
 0x135   : > { %1622 = vst.msk [vmem:[%s2311_s28 + $0x338] sm:$0xff] %vm1518_vm3, %v1493_v55  ;;  %1556 = vst.msk [vmem:[%s2311_s28 + $0x128] sm:$0xff] %vm1518_vm3, %v1427_v56  ;;  %v1957_v58 = vpop.f32.mrb[40].mxu0 }
 0x136   : > { %1620 = vst.msk [vmem:[%s2311_s28 + $0x328] sm:$0xff] %vm1518_vm3, %v1491_v57  ;;  %v1048_v59 = vadd.f32 %v1957_v58, %v2304_v6  ;;  %v2021_v60 = vpop.f32.mrb[40].mxu1  ;;  %v1039_v61 = vpop.f32.mrb[41].mxu0 }
 0x137   : > { %v1304_v62 = vadd.f32 %v2021_v60, %v2304_v6  ;;  %v1040_v63 = vadd.f32 %v2304_v6, %v1039_v61  ;;  %v1295_v0 = vpop.f32.mrb[41].mxu1  ;;  %v1958_v1 = vpop.f32.mrb[42].mxu0 }
 0x138   : > { %v1432_v2 = vmax.f32 %v1048_v59, 0.0  ;;  %v1296_v3 = vadd.f32 %v2304_v6, %v1295_v0  ;;  %v1051_v4 = vadd.f32 %v1958_v1, %v2304_v6  ;;  %v2022_v5 = vpop.f32.mrb[42].mxu1  ;;  %v1042_v7 = vpop.f32.mrb[43].mxu0 }
 0x139   : > { %v1496_v8 = vmax.f32 %v1304_v62, 0.0  ;;  %v1430_v9 = vmax.f32 %v1040_v63, 0.0  ;;  %v1307_v10 = vadd.f32 %v2022_v5, %v2304_v6  ;;  %v1043_v11 = vadd.f32 %v2304_v6, %v1042_v7  ;;  %v1298_v12 = vpop.f32.mrb[43].mxu1 }
 0x13a   : > { %1561 = vst.msk [vmem:[%s2311_s28 + $0x150] sm:$0xff] %vm1518_vm3, %v1432_v2  ;;  %v1494_v13 = vmax.f32 %v1296_v3, 0.0  ;;  %v1433_v14 = vmax.f32 %v1051_v4, 0.0  ;;  %v1299_v15 = vadd.f32 %v2304_v6, %v1298_v12 }
 0x13b   : > { %1625 = vst.msk [vmem:[%s2311_s28 + $0x350] sm:$0xff] %vm1518_vm3, %v1496_v8  ;;  %1559 = vst.msk [vmem:[%s2311_s28 + $0x140] sm:$0xff] %vm1518_vm3, %v1430_v9  ;;  %v1497_v16 = vmax.f32 %v1307_v10, 0.0  ;;  %v1431_v17 = vmax.f32 %v1043_v11, 0.0 }
 0x13c   : > { %1623 = vst.msk [vmem:[%s2311_s28 + $0x340] sm:$0xff] %vm1518_vm3, %v1494_v13  ;;  %1562 = vst.msk [vmem:[%s2311_s28 + $0x158] sm:$0xff] %vm1518_vm3, %v1433_v14  ;;  %v1495_v18 = vmax.f32 %v1299_v15, 0.0 }
 0x13d   : > { %1626 = vst.msk [vmem:[%s2311_s28 + $0x358] sm:$0xff] %vm1518_vm3, %v1497_v16  ;;  %1560 = vst.msk [vmem:[%s2311_s28 + $0x148] sm:$0xff] %vm1518_vm3, %v1431_v17  ;;  %v1961_v19 = vpop.f32.mrb[44].mxu0 }
 0x13e   : > { %1624 = vst.msk [vmem:[%s2311_s28 + $0x348] sm:$0xff] %vm1518_vm3, %v1495_v18  ;;  %v1064_v20 = vadd.f32 %v1961_v19, %v2304_v6  ;;  %v2025_v21 = vpop.f32.mrb[44].mxu1  ;;  %v1055_v22 = vpop.f32.mrb[45].mxu0 }
 0x13f   : > { %v1320_v23 = vadd.f32 %v2025_v21, %v2304_v6  ;;  %v1056_v24 = vadd.f32 %v2304_v6, %v1055_v22  ;;  %v1311_v25 = vpop.f32.mrb[45].mxu1  ;;  %v1962_v26 = vpop.f32.mrb[46].mxu0 }
 0x140   : > { %v1436_v27 = vmax.f32 %v1064_v20, 0.0  ;;  %v1312_v28 = vadd.f32 %v2304_v6, %v1311_v25  ;;  %v1067_v29 = vadd.f32 %v1962_v26, %v2304_v6  ;;  %v2026_v30 = vpop.f32.mrb[46].mxu1  ;;  %v1058_v31 = vpop.f32.mrb[47].mxu0 }
 0x141   : > { %v1500_v32 = vmax.f32 %v1320_v23, 0.0  ;;  %v1434_v33 = vmax.f32 %v1056_v24, 0.0  ;;  %v1323_v34 = vadd.f32 %v2026_v30, %v2304_v6  ;;  %v1059_v35 = vadd.f32 %v2304_v6, %v1058_v31  ;;  %v1314_v36 = vpop.f32.mrb[47].mxu1 }
 0x142   : > { %1565 = vst.msk [vmem:[%s2311_s28 + $0x170] sm:$0xff] %vm1518_vm3, %v1436_v27  ;;  %v1498_v37 = vmax.f32 %v1312_v28, 0.0  ;;  %v1437_v38 = vmax.f32 %v1067_v29, 0.0  ;;  %v1315_v39 = vadd.f32 %v2304_v6, %v1314_v36 }
 0x143   : > { %1629 = vst.msk [vmem:[%s2311_s28 + $0x370] sm:$0xff] %vm1518_vm3, %v1500_v32  ;;  %1563 = vst.msk [vmem:[%s2311_s28 + $0x160] sm:$0xff] %vm1518_vm3, %v1434_v33  ;;  %v1501_v40 = vmax.f32 %v1323_v34, 0.0  ;;  %v1435_v41 = vmax.f32 %v1059_v35, 0.0 }
 0x144   : > { %1627 = vst.msk [vmem:[%s2311_s28 + $0x360] sm:$0xff] %vm1518_vm3, %v1498_v37  ;;  %1566 = vst.msk [vmem:[%s2311_s28 + $0x178] sm:$0xff] %vm1518_vm3, %v1437_v38  ;;  %v1499_v42 = vmax.f32 %v1315_v39, 0.0 }
 0x145   : > { %1630 = vst.msk [vmem:[%s2311_s28 + $0x378] sm:$0xff] %vm1518_vm3, %v1501_v40  ;;  %1564 = vst.msk [vmem:[%s2311_s28 + $0x168] sm:$0xff] %vm1518_vm3, %v1435_v41  ;;  %v1965_v43 = vpop.f32.mrb[48].mxu0 }
 0x146   : > { %1628 = vst.msk [vmem:[%s2311_s28 + $0x368] sm:$0xff] %vm1518_vm3, %v1499_v42  ;;  %v1080_v44 = vadd.f32 %v1965_v43, %v2304_v6  ;;  %v2029_v45 = vpop.f32.mrb[48].mxu1  ;;  %v1071_v46 = vpop.f32.mrb[49].mxu0 }
 0x147   : > { %v1336_v47 = vadd.f32 %v2029_v45, %v2304_v6  ;;  %v1072_v48 = vadd.f32 %v2304_v6, %v1071_v46  ;;  %v1327_v49 = vpop.f32.mrb[49].mxu1  ;;  %v1966_v50 = vpop.f32.mrb[50].mxu0 }
 0x148   : > { %v1440_v51 = vmax.f32 %v1080_v44, 0.0  ;;  %v1328_v52 = vadd.f32 %v2304_v6, %v1327_v49  ;;  %v1083_v53 = vadd.f32 %v1966_v50, %v2304_v6  ;;  %v2030_v54 = vpop.f32.mrb[50].mxu1  ;;  %v1074_v55 = vpop.f32.mrb[51].mxu0 }
 0x149   : > { %v1504_v56 = vmax.f32 %v1336_v47, 0.0  ;;  %v1438_v57 = vmax.f32 %v1072_v48, 0.0  ;;  %v1339_v58 = vadd.f32 %v2030_v54, %v2304_v6  ;;  %v1075_v59 = vadd.f32 %v2304_v6, %v1074_v55  ;;  %v1330_v60 = vpop.f32.mrb[51].mxu1 }
 0x14a   : > { %1569 = vst.msk [vmem:[%s2311_s28 + $0x190] sm:$0xff] %vm1518_vm3, %v1440_v51  ;;  %v1502_v61 = vmax.f32 %v1328_v52, 0.0  ;;  %v1441_v62 = vmax.f32 %v1083_v53, 0.0  ;;  %v1331_v63 = vadd.f32 %v2304_v6, %v1330_v60 }
 0x14b   : > { %1633 = vst.msk [vmem:[%s2311_s28 + $0x390] sm:$0xff] %vm1518_vm3, %v1504_v56  ;;  %1567 = vst.msk [vmem:[%s2311_s28 + $0x180] sm:$0xff] %vm1518_vm3, %v1438_v57  ;;  %v1505_v0 = vmax.f32 %v1339_v58, 0.0  ;;  %v1439_v1 = vmax.f32 %v1075_v59, 0.0 }
 0x14c   : > { %1631 = vst.msk [vmem:[%s2311_s28 + $0x380] sm:$0xff] %vm1518_vm3, %v1502_v61  ;;  %1570 = vst.msk [vmem:[%s2311_s28 + $0x198] sm:$0xff] %vm1518_vm3, %v1441_v62  ;;  %v1503_v2 = vmax.f32 %v1331_v63, 0.0 }
 0x14d   : > { %1634 = vst.msk [vmem:[%s2311_s28 + $0x398] sm:$0xff] %vm1518_vm3, %v1505_v0  ;;  %1568 = vst.msk [vmem:[%s2311_s28 + $0x188] sm:$0xff] %vm1518_vm3, %v1439_v1  ;;  %v1969_v3 = vpop.f32.mrb[52].mxu0 }
 0x14e   : > { %1632 = vst.msk [vmem:[%s2311_s28 + $0x388] sm:$0xff] %vm1518_vm3, %v1503_v2  ;;  %v1096_v4 = vadd.f32 %v1969_v3, %v2304_v6  ;;  %v2033_v5 = vpop.f32.mrb[52].mxu1  ;;  %v1087_v7 = vpop.f32.mrb[53].mxu0 }
 0x14f   : > { %v1352_v8 = vadd.f32 %v2033_v5, %v2304_v6  ;;  %v1088_v9 = vadd.f32 %v2304_v6, %v1087_v7  ;;  %v1343_v10 = vpop.f32.mrb[53].mxu1  ;;  %v1970_v11 = vpop.f32.mrb[54].mxu0 }
 0x150   : > { %v1444_v12 = vmax.f32 %v1096_v4, 0.0  ;;  %v1344_v13 = vadd.f32 %v2304_v6, %v1343_v10  ;;  %v1099_v14 = vadd.f32 %v1970_v11, %v2304_v6  ;;  %v2034_v15 = vpop.f32.mrb[54].mxu1  ;;  %v1090_v16 = vpop.f32.mrb[55].mxu0 }
 0x151   : > { %v1508_v17 = vmax.f32 %v1352_v8, 0.0  ;;  %v1442_v18 = vmax.f32 %v1088_v9, 0.0  ;;  %v1355_v19 = vadd.f32 %v2034_v15, %v2304_v6  ;;  %v1091_v20 = vadd.f32 %v2304_v6, %v1090_v16  ;;  %v1346_v21 = vpop.f32.mrb[55].mxu1 }
 0x152   : > { %1573 = vst.msk [vmem:[%s2311_s28 + $0x1b0] sm:$0xff] %vm1518_vm3, %v1444_v12  ;;  %v1506_v22 = vmax.f32 %v1344_v13, 0.0  ;;  %v1445_v23 = vmax.f32 %v1099_v14, 0.0  ;;  %v1347_v24 = vadd.f32 %v2304_v6, %v1346_v21 }
 0x153   : > { %1637 = vst.msk [vmem:[%s2311_s28 + $0x3b0] sm:$0xff] %vm1518_vm3, %v1508_v17  ;;  %1571 = vst.msk [vmem:[%s2311_s28 + $0x1a0] sm:$0xff] %vm1518_vm3, %v1442_v18  ;;  %v1509_v25 = vmax.f32 %v1355_v19, 0.0  ;;  %v1443_v26 = vmax.f32 %v1091_v20, 0.0 }
 0x154   : > { %1635 = vst.msk [vmem:[%s2311_s28 + $0x3a0] sm:$0xff] %vm1518_vm3, %v1506_v22  ;;  %1574 = vst.msk [vmem:[%s2311_s28 + $0x1b8] sm:$0xff] %vm1518_vm3, %v1445_v23  ;;  %v1507_v27 = vmax.f32 %v1347_v24, 0.0 }
 0x155   : > { %1638 = vst.msk [vmem:[%s2311_s28 + $0x3b8] sm:$0xff] %vm1518_vm3, %v1509_v25  ;;  %1572 = vst.msk [vmem:[%s2311_s28 + $0x1a8] sm:$0xff] %vm1518_vm3, %v1443_v26  ;;  %v1973_v28 = vpop.f32.mrb[56].mxu0 }
 0x156   : > { %1636 = vst.msk [vmem:[%s2311_s28 + $0x3a8] sm:$0xff] %vm1518_vm3, %v1507_v27  ;;  %v1112_v29 = vadd.f32 %v1973_v28, %v2304_v6  ;;  %v2037_v30 = vpop.f32.mrb[56].mxu1  ;;  %v1103_v31 = vpop.f32.mrb[57].mxu0 }
 0x157   : > { %v1368_v32 = vadd.f32 %v2037_v30, %v2304_v6  ;;  %v1104_v33 = vadd.f32 %v2304_v6, %v1103_v31  ;;  %v1359_v34 = vpop.f32.mrb[57].mxu1  ;;  %v1974_v35 = vpop.f32.mrb[58].mxu0 }
 0x158   : > { %v1448_v36 = vmax.f32 %v1112_v29, 0.0  ;;  %v1360_v37 = vadd.f32 %v2304_v6, %v1359_v34  ;;  %v1115_v38 = vadd.f32 %v1974_v35, %v2304_v6  ;;  %v2038_v39 = vpop.f32.mrb[58].mxu1  ;;  %v1106_v40 = vpop.f32.mrb[59].mxu0 }
 0x159   : > { %v1512_v41 = vmax.f32 %v1368_v32, 0.0  ;;  %v1446_v42 = vmax.f32 %v1104_v33, 0.0  ;;  %v1371_v43 = vadd.f32 %v2038_v39, %v2304_v6  ;;  %v1107_v44 = vadd.f32 %v2304_v6, %v1106_v40  ;;  %v1362_v45 = vpop.f32.mrb[59].mxu1 }
 0x15a   : > { %1577 = vst.msk [vmem:[%s2311_s28 + $0x1d0] sm:$0xff] %vm1518_vm3, %v1448_v36  ;;  %v1510_v46 = vmax.f32 %v1360_v37, 0.0  ;;  %v1449_v47 = vmax.f32 %v1115_v38, 0.0  ;;  %v1363_v48 = vadd.f32 %v2304_v6, %v1362_v45 }
 0x15b   : > { %1641 = vst.msk [vmem:[%s2311_s28 + $0x3d0] sm:$0xff] %vm1518_vm3, %v1512_v41  ;;  %1575 = vst.msk [vmem:[%s2311_s28 + $0x1c0] sm:$0xff] %vm1518_vm3, %v1446_v42  ;;  %v1513_v49 = vmax.f32 %v1371_v43, 0.0  ;;  %v1447_v50 = vmax.f32 %v1107_v44, 0.0 }
 0x15c   : > { %1639 = vst.msk [vmem:[%s2311_s28 + $0x3c0] sm:$0xff] %vm1518_vm3, %v1510_v46  ;;  %1578 = vst.msk [vmem:[%s2311_s28 + $0x1d8] sm:$0xff] %vm1518_vm3, %v1449_v47  ;;  %v1511_v51 = vmax.f32 %v1363_v48, 0.0 }
 0x15d   : > { %1642 = vst.msk [vmem:[%s2311_s28 + $0x3d8] sm:$0xff] %vm1518_vm3, %v1513_v49  ;;  %1576 = vst.msk [vmem:[%s2311_s28 + $0x1c8] sm:$0xff] %vm1518_vm3, %v1447_v50  ;;  %v1977_v52 = vpop.f32.mrb[60].mxu0 }
 0x15e   : > { %1640 = vst.msk [vmem:[%s2311_s28 + $0x3c8] sm:$0xff] %vm1518_vm3, %v1511_v51  ;;  %v1128_v53 = vadd.f32 %v1977_v52, %v2304_v6  ;;  %v2041_v54 = vpop.f32.mrb[60].mxu1  ;;  %v1119_v55 = vpop.f32.mrb[61].mxu0 }
 0x15f   : > { %v1384_v56 = vadd.f32 %v2041_v54, %v2304_v6  ;;  %v1120_v57 = vadd.f32 %v2304_v6, %v1119_v55  ;;  %v1375_v58 = vpop.f32.mrb[61].mxu1  ;;  %v1978_v59 = vpop.f32.mrb[62].mxu0 }
 0x160   : > { %v1452_v60 = vmax.f32 %v1128_v53, 0.0  ;;  %v1376_v61 = vadd.f32 %v2304_v6, %v1375_v58  ;;  %v1131_v62 = vadd.f32 %v1978_v59, %v2304_v6  ;;  %v2042_v63 = vpop.f32.mrb[62].mxu1  ;;  %v1122_v0 = vpop.f32.mrb[63].mxu0 }
 0x161   : > { %v1516_v1 = vmax.f32 %v1384_v56, 0.0  ;;  %v1450_v2 = vmax.f32 %v1120_v57, 0.0  ;;  %v1387_v3 = vadd.f32 %v2042_v63, %v2304_v6  ;;  %v1123_v4 = vadd.f32 %v2304_v6, %v1122_v0  ;;  %v1378_v5 = vpop.f32.mrb[63].mxu1 }
 0x162   : > { %1581 = vst.msk [vmem:[%s2311_s28 + $0x1f0] sm:$0xff] %vm1518_vm3, %v1452_v60  ;;  %v1514_v7 = vmax.f32 %v1376_v61, 0.0  ;;  %v1453_v8 = vmax.f32 %v1131_v62, 0.0  ;;  %v1379_v9 = vadd.f32 %v2304_v6, %v1378_v5 }
 0x163   : > { %1645 = vst.msk [vmem:[%s2311_s28 + $0x3f0] sm:$0xff] %vm1518_vm3, %v1516_v1  ;;  %1579 = vst.msk [vmem:[%s2311_s28 + $0x1e0] sm:$0xff] %vm1518_vm3, %v1450_v2  ;;  %v1517_v10 = vmax.f32 %v1387_v3, 0.0  ;;  %v1451_v11 = vmax.f32 %v1123_v4, 0.0 }
 0x164   : > { %1643 = vst.msk [vmem:[%s2311_s28 + $0x3e0] sm:$0xff] %vm1518_vm3, %v1514_v7  ;;  %1582 = vst.msk [vmem:[%s2311_s28 + $0x1f8] sm:$0xff] %vm1518_vm3, %v1453_v8  ;;  %v1515_v12 = vmax.f32 %v1379_v9, 0.0 }
 0x165   : > { %1646 = vst.msk [vmem:[%s2311_s28 + $0x3f8] sm:$0xff] %vm1518_vm3, %v1517_v10  ;;  %1580 = vst.msk [vmem:[%s2311_s28 + $0x1e8] sm:$0xff] %vm1518_vm3, %v1451_v11 }
 0x166   : > { %1644 = vst.msk [vmem:[%s2311_s28 + $0x3e8] sm:$0xff] %vm1518_vm3, %v1515_v12 }
 0x167 PF: > { %s13_s12 = sadd.s32 1, %s2128_s12  }
 0x168   : > { %p10_p4 = scmp.ge.s32.totalorder %s13_s12, 34  }
 0x16a   :  { %12 = sbr.rel (!%p10_p4) target bundleno = 1 (0x1), region = 62 }

</bundles_post_ra>
